<compile_context>
chip_gen: v7x
topology: tpu7x:2x2x1
jax: 0.10.0
libtpu: 0.0.40
codegen_flags: <defaults>
</compile_context>

<pallas_src>
import functools

import jax
import jax.numpy as jnp
from jax.experimental import pallas as pl
from jax.experimental.pallas import tpu as pltpu


def _round_up(v, m):
    return ((v + m - 1) // m) * m


def _hw_tile_config():
    """(tn_max, vmem_limit_bytes, is_v7x) picked per TPU generation."""
    kind = ""
    try:
        kind = jax.devices()[0].device_kind.lower()
    except Exception:
        pass
    if "v7" in kind:
        # 64 MiB VMEM per TensorCore, 2 TCs: cap tile, keep grid splittable.
        return 2048, 48 << 20, True
    if "v5" in kind or "v6" in kind:
        # 128 MiB physical VMEM: big tiles amortize per-step overhead.
        return 4096, 96 << 20, False
    # Unknown / emulator: conservative defaults.
    return 2048, 48 << 20, False


def _lbcnn_kernel(x_ref, y_ref, a0_ref, alphaT_ref, b0r_ref, betaT_ref,
                  pi_ref, cbT_ref, cbaug_ref, out_ref, *, n_valid, m):
    """One batch tile of the expected log-likelihood.

    Shapes (f32 unless noted):
      x      : (TN, F)     input features (batch tile)
      y      : (TN, 1)     int32 labels (batch tile)
      a0     : (1, M)      alpha_0
      alphaT : (F, M)      alpha.T            (transpose hoisted to wrapper)
      b0r    : (1, C)      beta_0 (row)
      betaT  : (M, C)      beta.T             (transpose hoisted to wrapper)
      pi     : (C, K)      softmax over classes of the code distribution (hoisted)
      cbT    : (M, K)      code book transpose (hoisted)
      cbaug  : (K, M+2)    [code_book | ones | log_terms]  (hoisted)
      out    : (1, 8, 128) per-tile partial sum broadcast into a lane-dense slab
    """
    tn = x_ref.shape[0]
    c = b0r_ref.shape[1]

    x = x_ref[...]
    yv = y_ref[...]                                   # (TN, 1) int32
    a0 = a0_ref[...]
    alpha_T = alphaT_ref[...]
    b0r = b0r_ref[...]
    beta_T = betaT_ref[...]
    pi = pi_ref[...]
    cb_T = cbT_ref[...]
    cb_aug = cbaug_ref[...]

    # One-hot labels built in-kernel (no (N, C) HBM traffic).
    yoh = (jax.lax.broadcasted_iota(jnp.int32, (tn, c), 1) == yv).astype(jnp.float32)

    # ---- compute_linear_eta: alpha_0 + x @ alpha.T -> (TN, M) ----
    linear_eta = a0 + jnp.dot(x, alpha_T, preferred_element_type=jnp.float32)
    # Stable softplus: log(1 + exp(x)) = max(x, 0) + log(1 + exp(-|x|))
    log1p_exp = (jnp.maximum(linear_eta, 0.0)
                 + jnp.log(1.0 + jnp.exp(-jnp.abs(linear_eta))))     # (TN, M)
    sum_log = jnp.sum(log1p_exp, axis=1, keepdims=True)              # (TN, 1)
    # (eta = sigmoid(linear_eta) does not contribute to the returned value.)

    # ---- P(Z|X) * pi[y] in one fused expression (TN, K) ----
    prod_eta_codes = jnp.dot(linear_eta, cb_T,
                             preferred_element_type=jnp.float32)     # (TN, K)
    pi_sel = jnp.dot(yoh, pi, preferred_element_type=jnp.float32)    # (TN, K)
    numerator = pi_sel * jnp.exp(prod_eta_codes - sum_log)           # (TN, K)

    # ---- all K-axis reductions in one MXU matmul against cb_aug ----
    #   cols [:M]  -> unnormalized E_IndZ
    #   col   M    -> denominator
    #   col   M+1  -> sum_k numerator * log_terms (EII numerator)
    red = jnp.dot(numerator, cb_aug, preferred_element_type=jnp.float32)  # (TN, M+2)
    e_ind_unnorm = red[:, :m]                                             # (TN, M)
    denominator = red[:, m:m + 1]                                         # (TN, 1)
    eii_num = red[:, m + 1:m + 2]                                         # (TN, 1)

    # Approx reciprocal on the EUP slot + one Newton step (restores ~1e-7 rel acc).
    inv_denom = pl.reciprocal(denominator, approx=True)
    inv_denom = inv_denom * (2.0 - denominator * inv_denom)

    E_IndZ = e_ind_unnorm * inv_denom                                     # (TN, M)

    # ---- EI ----
    EZ = 2.0 * E_IndZ - 1.0                                               # (TN, M)
    linear = b0r + jnp.dot(EZ, beta_T,
                           preferred_element_type=jnp.float32)            # (TN, C)
    EI_row = jnp.sum(yoh * linear, axis=1, keepdims=True)                 # (TN, 1)

    # ---- EII / EIII / EIV ----
    EII_row = eii_num * inv_denom                                         # (TN, 1)
    EIII_row = jnp.sum(E_IndZ * linear_eta, axis=1, keepdims=True)        # (TN, 1)
    EIV_row = sum_log                                                     # reuse

    row_ll = EI_row - EII_row + EIII_row - EIV_row                        # (TN, 1)

    # Mask padded batch rows.
    row_idx = (pl.program_id(0) * tn
               + jax.lax.broadcasted_iota(jnp.int32, (tn, 1), 0))
    mask = (row_idx < n_valid).astype(jnp.float32)
    partial = jnp.sum(mask * row_ll)

    out_ref[...] = jnp.full((1, 8, 128), partial, dtype=jnp.float32)


@functools.partial(jax.jit, static_argnames=("num_classes",))
def lb_cnn_forward(x, y, params, code_book, *, num_classes):
    """Wrapper: hoists pi block + transposes, pads/tiles the batch, sums partials."""
    alpha_0, alpha, beta_0, beta = params
    n, f = x.shape
    m = alpha.shape[0]
    k = code_book.shape[0]
    c = num_classes

    # ---- per-generation batch tiling ----
    tn_max, vmem_limit, is_v7x = _hw_tile_config()
    tn = min(tn_max, _round_up(n, 8))
    npad = _round_up(n, tn)
    g = npad // tn
    if is_v7x and g == 1 and tn >= 16:
        # Split the single tile so the "parallel" axis feeds both TensorCores.
        tn = _round_up(max(tn // 2, 8), 8)
        npad = _round_up(n, tn)
        g = npad // tn

    pad_n = npad - n
    x_pad = jnp.pad(x, ((0, pad_n), (0, 0))) if pad_n else x
    y2 = y.reshape(n, 1).astype(jnp.int32)
    y_pad = jnp.pad(y2, ((0, pad_n), (0, 0))) if pad_n else y2
    # TODO(synk): labels stay as a lane-padded (tn,1) VMEM block (~0.5-2 MiB); move
    # to SMEM scalar-prefetch only if VMEM ever gets tight on v7x.

    # ---- batch-independent pi block, computed ONCE (stable, max-shifted) ----
    code_book = code_book.astype(jnp.float32)
    mod_codes = 2.0 * code_book - 1.0                                  # (K, M)
    linear_pi = beta_0.reshape(c, 1) + beta @ mod_codes.T              # (C, K)
    mx = jnp.max(linear_pi, axis=0, keepdims=True)                     # (1, K)
    exp_shift = jnp.exp(linear_pi - mx)                                # (C, K)
    sum_shift = jnp.sum(exp_shift, axis=0, keepdims=True)              # (1, K)
    pi = exp_shift / sum_shift                                         # (C, K)
    log_terms = mx + jnp.log(sum_shift)                                # (1, K)

    # Augmented code book: [cb | ones | log_terms] -> one MXU matmul does
    # E_IndZ numerator, denominator and the EII numerator-sum at once.
    cb_aug = jnp.concatenate(
        [code_book,
         jnp.ones((k, 1), jnp.float32),
         log_terms.reshape(k, 1)], axis=1)                             # (K, M+2)

    # ---- parameter plumbing (all transposes done here, once) ----
    a0 = alpha_0.reshape(1, m)
    alpha_T = alpha.T                   # (F, M)
    b0_row = beta_0.reshape(1, c)
    beta_T = beta.T                     # (M, C)
    cb_T = code_book.T                  # (M, K)

    const = lambda i: (0, 0)
    grid_spec = pltpu.PrefetchScalarGridSpec(
        num_scalar_prefetch=0,
        grid=(g,),
        in_specs=[
            pl.BlockSpec((tn, f), lambda i: (i, 0)),   # x tile
            pl.BlockSpec((tn, 1), lambda i: (i, 0)),   # labels tile
            pl.BlockSpec((1, m), const),               # alpha_0
            pl.BlockSpec((f, m), const),               # alpha.T
            pl.BlockSpec((1, c), const),               # beta_0 row
            pl.BlockSpec((m, c), const),               # beta.T
            pl.BlockSpec((c, k), const),               # pi (hoisted)
            pl.BlockSpec((m, k), const),               # code book.T
            pl.BlockSpec((k, m + 2), const),           # augmented code book
        ],
        out_specs=pl.BlockSpec((1, 8, 128), lambda i: (i, 0, 0)),
    )

    kernel = functools.partial(_lbcnn_kernel, n_valid=n, m=m)
    partials = pl.pallas_call(
        kernel,
        out_shape=jax.ShapeDtypeStruct((g, 8, 128), jnp.float32),
        grid_spec=grid_spec,
        compiler_params=pltpu.CompilerParams(
            dimension_semantics=("parallel",),
            vmem_limit_bytes=vmem_limit,
        ),
    )(x_pad, y_pad, a0, alpha_T, b0_row, beta_T, pi, cb_T, cb_aug)

    return jnp.sum(partials[:, 0, 0])


def make_code_book(m):
    """binaryValues(m): all 2^m binary codes, last bit varying fastest."""
    idx = jnp.arange(2 ** m, dtype=jnp.int32)
    shifts = (m - 1 - jnp.arange(m, dtype=jnp.int32))
    return ((idx[:, None] >> shifts[None, :]) & 1).astype(jnp.float32)


def init_params(key, num_features, num_classes, latent_size):
    k1, k2, k3, k4 = jax.random.split(key, 4)
    init_c1 = 2.0 / jnp.sqrt(jnp.float32(num_features))
    init_c2 = 2.0 / jnp.sqrt(jnp.float32(latent_size))
    alpha_0 = jax.random.normal(k1, (latent_size,), jnp.float32)
    alpha = init_c1 * jax.random.normal(k2, (latent_size, num_features),
                                        jnp.float32)
    beta_0 = jax.random.normal(k3, (num_classes,), jnp.float32)
    beta = init_c2 * jax.random.normal(k4, (num_classes, latent_size),
                                       jnp.float32)
    return alpha_0, alpha, beta_0, beta


def _reference_forward(x, y, params, code_book, num_classes):
    """Pure-JAX reference mirroring the torch code, for a correctness check."""
    alpha_0, alpha, beta_0, beta = params
    y1h = jax.nn.one_hot(y, num_classes, dtype=jnp.float32)
    linear_eta = alpha_0[None, :] + x @ alpha.T
    log1p_exp = jnp.log(1.0 + jnp.exp(linear_eta))
    mod_codes = 2.0 * code_book - 1.0
    linear_pi = beta_0[:, None] + beta @ mod_codes.T
    exp_pi = jnp.exp(linear_pi)
    pi = exp_pi / jnp.sum(exp_pi, axis=0, keepdims=True)
    P_ZgivenX = jnp.exp(linear_eta @ code_book.T
                        - jnp.sum(log1p_exp, axis=1, keepdims=True))
    numerator = (y1h @ pi) * P_ZgivenX
    denominator = jnp.sum(numerator, axis=1, keepdims=True)
    E_IndZ = (numerator @ code_book) / denominator
    EZ = 2.0 * E_IndZ - 1.0
    EI = jnp.sum(y1h * (beta_0[None, :] + EZ @ beta.T))
    log_terms = jnp.log(jnp.sum(exp_pi, axis=0))
    EII = jnp.sum(log_terms[None, :] * (numerator / denominator))
    EIII = jnp.sum(E_IndZ * linear_eta)
    EIV = jnp.sum(log1p_exp)
    return EI - EII + EIII - EIV


if __name__ == "__main__":
    # Small, module-consistent shapes.
    NUM_FEATURES = 32
    NUM_CLASSES = 4
    LATENT_SIZE = 8          # M -> code book has 2^8 = 256 codes
    BATCH = 8

    key = jax.random.PRNGKey(0)
    k_param, k_x, k_y = jax.random.split(key, 3)

    params = init_params(k_param, NUM_FEATURES, NUM_CLASSES, LATENT_SIZE)
    code_book = make_code_book(LATENT_SIZE)

    x = jax.random.normal(k_x, (BATCH, NUM_FEATURES), jnp.float32)
    y = jax.random.randint(k_y, (BATCH,), 0, NUM_CLASSES, jnp.int32)

    ell = lb_cnn_forward(x, y, params, code_book, num_classes=NUM_CLASSES)
    ell = jax.block_until_ready(ell)

    ref = _reference_forward(x, y, params, code_book, NUM_CLASSES)
    assert jnp.allclose(ell, ref, rtol=1e-4, atol=1e-3), (ell, ref)

    print("KERNEL_OK")
</pallas_src>

<mosaic_0001>
module attributes {stable_mosaic.version = 11 : i64} {
  func.func @_lbcnn_kernel(%arg0: i32, %arg1: memref<8x32xf32, #tpu.memory_space<vmem>>, %arg2: memref<8x1xi32, #tpu.memory_space<vmem>>, %arg3: memref<1x8xf32, #tpu.memory_space<vmem>>, %arg4: memref<32x8xf32, #tpu.memory_space<vmem>>, %arg5: memref<1x4xf32, #tpu.memory_space<vmem>>, %arg6: memref<8x4xf32, #tpu.memory_space<vmem>>, %arg7: memref<4x256xf32, #tpu.memory_space<vmem>>, %arg8: memref<8x256xf32, #tpu.memory_space<vmem>>, %arg9: memref<256x10xf32, #tpu.memory_space<vmem>>, %arg10: memref<1x8x128xf32, #tpu.memory_space<vmem>>) attributes {dimension_semantics = [#tpu.dimension_semantics<parallel>], iteration_bounds = array<i64: 1>, scalar_prefetch = 0 : i64, scratch_operands = 0 : i64, tpu.core_type = #tpu.core_type<tc>, window_params = [{transform_indices = @transform_0, window_bounds = array<i64: 8, 32>}, {transform_indices = @transform_1, window_bounds = array<i64: 8, 1>}, {pipeline_mode = #tpu.pipeline_mode<synchronous>, transform_indices = @transform_2, window_bounds = array<i64: 1, 8>}, {pipeline_mode = #tpu.pipeline_mode<synchronous>, transform_indices = @transform_3, window_bounds = array<i64: 32, 8>}, {pipeline_mode = #tpu.pipeline_mode<synchronous>, transform_indices = @transform_4, window_bounds = array<i64: 1, 4>}, {pipeline_mode = #tpu.pipeline_mode<synchronous>, transform_indices = @transform_5, window_bounds = array<i64: 8, 4>}, {pipeline_mode = #tpu.pipeline_mode<synchronous>, transform_indices = @transform_6, window_bounds = array<i64: 4, 256>}, {pipeline_mode = #tpu.pipeline_mode<synchronous>, transform_indices = @transform_7, window_bounds = array<i64: 8, 256>}, {pipeline_mode = #tpu.pipeline_mode<synchronous>, transform_indices = @transform_8, window_bounds = array<i64: 256, 10>}, {transform_indices = @transform_9, window_bounds = array<i64: 1, 8, 128>}]} {
    %c0 = arith.constant 0 : index
    %c0_0 = arith.constant 0 : index
    %0 = vector.load %arg1[%c0, %c0_0] : memref<8x32xf32, #tpu.memory_space<vmem>>, vector<8x32xf32>
    %c0_1 = arith.constant 0 : index
    %c0_2 = arith.constant 0 : index
    %1 = vector.load %arg2[%c0_1, %c0_2] : memref<8x1xi32, #tpu.memory_space<vmem>>, vector<8x1xi32>
    %c0_3 = arith.constant 0 : index
    %c0_4 = arith.constant 0 : index
    %2 = vector.load %arg3[%c0_3, %c0_4] : memref<1x8xf32, #tpu.memory_space<vmem>>, vector<1x8xf32>
    %c0_5 = arith.constant 0 : index
    %c0_6 = arith.constant 0 : index
    %3 = vector.load %arg4[%c0_5, %c0_6] : memref<32x8xf32, #tpu.memory_space<vmem>>, vector<32x8xf32>
    %c0_7 = arith.constant 0 : index
    %c0_8 = arith.constant 0 : index
    %4 = vector.load %arg5[%c0_7, %c0_8] : memref<1x4xf32, #tpu.memory_space<vmem>>, vector<1x4xf32>
    %c0_9 = arith.constant 0 : index
    %c0_10 = arith.constant 0 : index
    %5 = vector.load %arg6[%c0_9, %c0_10] : memref<8x4xf32, #tpu.memory_space<vmem>>, vector<8x4xf32>
    %c0_11 = arith.constant 0 : index
    %c0_12 = arith.constant 0 : index
    %6 = vector.load %arg7[%c0_11, %c0_12] : memref<4x256xf32, #tpu.memory_space<vmem>>, vector<4x256xf32>
    %c0_13 = arith.constant 0 : index
    %c0_14 = arith.constant 0 : index
    %7 = vector.load %arg8[%c0_13, %c0_14] : memref<8x256xf32, #tpu.memory_space<vmem>>, vector<8x256xf32>
    %c0_15 = arith.constant 0 : index
    %c0_16 = arith.constant 0 : index
    %8 = vector.load %arg9[%c0_15, %c0_16] : memref<256x10xf32, #tpu.memory_space<vmem>>, vector<256x10xf32>
    %9 = tpu.iota {dimensions = array<i32: 1>} : vector<8x4xi32>
    %10 = vector.broadcast %1 : vector<8x1xi32> to vector<8x4xi32>
    %11 = arith.cmpi eq, %9, %10 : vector<8x4xi32>
    %12 = arith.extui %11 : vector<8x4xi1> to vector<8x4xi32>
    %13 = arith.sitofp %12 : vector<8x4xi32> to vector<8x4xf32>
    %cst = arith.constant dense<0.000000e+00> : vector<8x8xf32>
    %14 = tpu.matmul %0, %3, %cst {dimension_numbers = #tpu.dot_dimension_numbers<[1], [0], [0], [1], [0, 0, 1, 1], [], []>} : vector<8x32xf32>, vector<32x8xf32>, vector<8x8xf32> -> vector<8x8xf32>
    %15 = vector.broadcast %2 : vector<1x8xf32> to vector<8x8xf32>
    %16 = arith.addf %15, %14 : vector<8x8xf32>
    %cst_17 = arith.constant 0.000000e+00 : f32
    %17 = vector.broadcast %cst_17 : f32 to vector<8x8xf32>
    %18 = arith.maximumf %16, %17 : vector<8x8xf32>
    %19 = math.absf %16 : vector<8x8xf32>
    %cst_18 = arith.constant 0.000000e+00 : f32
    %20 = vector.broadcast %cst_18 : f32 to vector<8x8xf32>
    %21 = arith.subf %20, %19 : vector<8x8xf32>
    %22 = math.exp %21 : vector<8x8xf32>
    %cst_19 = arith.constant 1.000000e+00 : f32
    %23 = vector.broadcast %cst_19 : f32 to vector<8x8xf32>
    %24 = arith.addf %23, %22 : vector<8x8xf32>
    %25 = math.log %24 : vector<8x8xf32>
    %26 = arith.addf %18, %25 : vector<8x8xf32>
    %cst_20 = arith.constant dense<0.000000e+00> : vector<8xf32>
    %27 = vector.multi_reduction <add>, %26, %cst_20 [1] : vector<8x8xf32> to vector<8xf32>
    %28 = vector.shape_cast %27 : vector<8xf32> to vector<8x1xf32>
    %cst_21 = arith.constant dense<0.000000e+00> : vector<8x256xf32>
    %29 = tpu.matmul %16, %7, %cst_21 {dimension_numbers = #tpu.dot_dimension_numbers<[1], [0], [0], [1], [0, 0, 1, 1], [], []>} : vector<8x8xf32>, vector<8x256xf32>, vector<8x256xf32> -> vector<8x256xf32>
    %cst_22 = arith.constant dense<0.000000e+00> : vector<8x256xf32>
    %30 = tpu.matmul %13, %6, %cst_22 {dimension_numbers = #tpu.dot_dimension_numbers<[1], [0], [0], [1], [0, 0, 1, 1], [], []>} : vector<8x4xf32>, vector<4x256xf32>, vector<8x256xf32> -> vector<8x256xf32>
    %31 = vector.broadcast %28 : vector<8x1xf32> to vector<8x256xf32>
    %32 = arith.subf %29, %31 : vector<8x256xf32>
    %33 = math.exp %32 : vector<8x256xf32>
    %34 = arith.mulf %30, %33 : vector<8x256xf32>
    %cst_23 = arith.constant dense<0.000000e+00> : vector<8x10xf32>
    %35 = tpu.matmul %34, %8, %cst_23 {dimension_numbers = #tpu.dot_dimension_numbers<[1], [0], [0], [1], [0, 0, 1, 1], [], []>} : vector<8x256xf32>, vector<256x10xf32>, vector<8x10xf32> -> vector<8x10xf32>
    %36 = vector.extract_strided_slice %35 {offsets = [0, 0], sizes = [8, 8], strides = [1, 1]} : vector<8x10xf32> to vector<8x8xf32>
    %37 = vector.extract_strided_slice %35 {offsets = [0, 8], sizes = [8, 1], strides = [1, 1]} : vector<8x10xf32> to vector<8x1xf32>
    %38 = vector.extract_strided_slice %35 {offsets = [0, 9], sizes = [8, 1], strides = [1, 1]} : vector<8x10xf32> to vector<8x1xf32>
    %39 = tpu.reciprocal %37 {approx = true} : vector<8x1xf32> -> vector<8x1xf32>
    %40 = arith.mulf %37, %39 : vector<8x1xf32>
    %cst_24 = arith.constant 2.000000e+00 : f32
    %41 = vector.broadcast %cst_24 : f32 to vector<8x1xf32>
    %42 = arith.subf %41, %40 : vector<8x1xf32>
    %43 = arith.mulf %39, %42 : vector<8x1xf32>
    %44 = vector.broadcast %43 : vector<8x1xf32> to vector<8x8xf32>
    %45 = arith.mulf %36, %44 : vector<8x8xf32>
    %cst_25 = arith.constant 2.000000e+00 : f32
    %46 = vector.broadcast %cst_25 : f32 to vector<8x8xf32>
    %47 = arith.mulf %46, %45 : vector<8x8xf32>
    %cst_26 = arith.constant 1.000000e+00 : f32
    %48 = vector.broadcast %cst_26 : f32 to vector<8x8xf32>
    %49 = arith.subf %47, %48 : vector<8x8xf32>
    %cst_27 = arith.constant dense<0.000000e+00> : vector<8x4xf32>
    %50 = tpu.matmul %49, %5, %cst_27 {dimension_numbers = #tpu.dot_dimension_numbers<[1], [0], [0], [1], [0, 0, 1, 1], [], []>} : vector<8x8xf32>, vector<8x4xf32>, vector<8x4xf32> -> vector<8x4xf32>
    %51 = vector.broadcast %4 : vector<1x4xf32> to vector<8x4xf32>
    %52 = arith.addf %51, %50 : vector<8x4xf32>
    %53 = arith.mulf %13, %52 : vector<8x4xf32>
    %cst_28 = arith.constant dense<0.000000e+00> : vector<8xf32>
    %54 = vector.multi_reduction <add>, %53, %cst_28 [1] : vector<8x4xf32> to vector<8xf32>
    %55 = vector.shape_cast %54 : vector<8xf32> to vector<8x1xf32>
    %56 = arith.mulf %38, %43 : vector<8x1xf32>
    %57 = arith.mulf %45, %16 : vector<8x8xf32>
    %cst_29 = arith.constant dense<0.000000e+00> : vector<8xf32>
    %58 = vector.multi_reduction <add>, %57, %cst_29 [1] : vector<8x8xf32> to vector<8xf32>
    %59 = vector.shape_cast %58 : vector<8xf32> to vector<8x1xf32>
    %60 = arith.subf %55, %56 : vector<8x1xf32>
    %61 = arith.addf %60, %59 : vector<8x1xf32>
    %62 = arith.subf %61, %28 : vector<8x1xf32>
    %c8_i32 = arith.constant 8 : i32
    %63 = arith.muli %arg0, %c8_i32 : i32
    %64 = tpu.iota {dimensions = array<i32: 0>} : vector<8x1xi32>
    %65 = vector.broadcast %63 : i32 to vector<8x1xi32>
    %66 = arith.addi %65, %64 : vector<8x1xi32>
    %c8_i32_30 = arith.constant 8 : i32
    %67 = vector.broadcast %c8_i32_30 : i32 to vector<8x1xi32>
    %68 = arith.cmpi slt, %66, %67 : vector<8x1xi32>
    %69 = arith.extui %68 : vector<8x1xi1> to vector<8x1xi32>
    %70 = arith.sitofp %69 : vector<8x1xi32> to vector<8x1xf32>
    %71 = arith.mulf %70, %62 : vector<8x1xf32>
    %72 = vector.shape_cast %71 : vector<8x1xf32> to vector<1x8x1xf32>
    %cst_31 = arith.constant dense<0.000000e+00> : vector<1xf32>
    %73 = vector.multi_reduction <add>, %72, %cst_31 [1, 2] : vector<1x8x1xf32> to vector<1xf32>
    %74 = vector.shape_cast %73 : vector<1xf32> to vector<1x1x1xf32>
    %75 = vector.extract %74[0, 0, 0] : f32 from vector<1x1x1xf32>
    %76 = vector.broadcast %75 : f32 to vector<1x8x128xf32>
    %c0_32 = arith.constant 0 : index
    %c0_33 = arith.constant 0 : index
    %c0_34 = arith.constant 0 : index
    %77 = vector.load %arg10[%c0_32, %c0_33, %c0_34] : memref<1x8x128xf32, #tpu.memory_space<vmem>>, vector<1x8x128xf32>
    tpu.vector_store %arg10[%c0_32, %c0_33, %c0_34], %76 {strides = array<i32>} : memref<1x8x128xf32, #tpu.memory_space<vmem>>, vector<1x8x128xf32>,
    return
  }
  func.func @transform_0(%arg0: i32) -> (i32, i32) {
    %c0_i32 = arith.constant 0 : i32
    %c0_i32_0 = arith.constant 0 : i32
    return %arg0, %c0_i32 : i32, i32
  }
  func.func @transform_1(%arg0: i32) -> (i32, i32) {
    %c0_i32 = arith.constant 0 : i32
    %c0_i32_0 = arith.constant 0 : i32
    return %arg0, %c0_i32 : i32, i32
  }
  func.func @transform_2(%arg0: i32) -> (i32, i32) {
    %c0_i32 = arith.constant 0 : i32
    %c0_i32_0 = arith.constant 0 : i32
    %c0_i32_1 = arith.constant 0 : i32
    return %c0_i32, %c0_i32_0 : i32, i32
  }
  func.func @transform_3(%arg0: i32) -> (i32, i32) {
    %c0_i32 = arith.constant 0 : i32
    %c0_i32_0 = arith.constant 0 : i32
    %c0_i32_1 = arith.constant 0 : i32
    return %c0_i32, %c0_i32_0 : i32, i32
  }
  func.func @transform_4(%arg0: i32) -> (i32, i32) {
    %c0_i32 = arith.constant 0 : i32
    %c0_i32_0 = arith.constant 0 : i32
    %c0_i32_1 = arith.constant 0 : i32
    return %c0_i32, %c0_i32_0 : i32, i32
  }
  func.func @transform_5(%arg0: i32) -> (i32, i32) {
    %c0_i32 = arith.constant 0 : i32
    %c0_i32_0 = arith.constant 0 : i32
    %c0_i32_1 = arith.constant 0 : i32
    return %c0_i32, %c0_i32_0 : i32, i32
  }
  func.func @transform_6(%arg0: i32) -> (i32, i32) {
    %c0_i32 = arith.constant 0 : i32
    %c0_i32_0 = arith.constant 0 : i32
    %c0_i32_1 = arith.constant 0 : i32
    return %c0_i32, %c0_i32_0 : i32, i32
  }
  func.func @transform_7(%arg0: i32) -> (i32, i32) {
    %c0_i32 = arith.constant 0 : i32
    %c0_i32_0 = arith.constant 0 : i32
    %c0_i32_1 = arith.constant 0 : i32
    return %c0_i32, %c0_i32_0 : i32, i32
  }
  func.func @transform_8(%arg0: i32) -> (i32, i32) {
    %c0_i32 = arith.constant 0 : i32
    %c0_i32_0 = arith.constant 0 : i32
    %c0_i32_1 = arith.constant 0 : i32
    return %c0_i32, %c0_i32_0 : i32, i32
  }
  func.func @transform_9(%arg0: i32) -> (i32, i32, i32) {
    %c0_i32 = arith.constant 0 : i32
    %c0_i32_0 = arith.constant 0 : i32
    %c0_i32_1 = arith.constant 0 : i32
    return %arg0, %c0_i32, %c0_i32_0 : i32, i32, i32
  }
}

</mosaic_0001>

<bundles_post_ra>
// kernel: lb_cnn_forward.1
= control target key start
LH: loop header
LB: loop body
LE: loop exit
PB: predicated region body
PF: predicated region fallthrough
CT: control target
= control target key end

     0   :  { %v678_v0 = vmov 0.0|0.0   ;;  %vm679_vm0 = vmmov 0   ;;  %v680_v4 = vmov 0.0   ;;  %v681_v7 = vmov 0   ;;  %s683_s13 = smov 1   ;;  %s890_s3 = inlined_call_operand.vmem [shape: f32[32,8], index: 3, kind: input, shape index: {}]   ;;  %s891_s1 = inlined_call_operand.vmem [shape: s32[8,1], index: 1, kind: input, shape index: {}]   ;;  %s892_s7 = inlined_call_operand.vmem [shape: f32[8,256], index: 7, kind: input, shape index: {}]   ;;  %s893_s0 = inlined_call_operand.vmem [shape: f32[8,32], index: 0, kind: input, shape index: {}]   ;;  %s894_s6 = inlined_call_operand.vmem [shape: f32[4,256], index: 6, kind: input, shape index: {}]   ;;  %s895_s2 = inlined_call_operand.vmem [shape: f32[1,8], index: 2, kind: input, shape index: {}]   ;;  %s896_s8 = inlined_call_operand.vmem [shape: f32[256,10], index: 8, kind: input, shape index: {}]   ;;  %s897_s5 = inlined_call_operand.vmem [shape: f32[8,4], index: 5, kind: input, shape index: {}]   ;;  %s898_s4 = inlined_call_operand.vmem [shape: f32[1,4], index: 4, kind: input, shape index: {}]   ;;  %s899_s9 = inlined_call_operand.vmem [shape: f32[1,8,128], index: 9, kind: output, shape index: {}]  }
   0x1   :  { %617 = vmatprep.subr.bf16.mxu0 %v678_v0  ;;  %v35_v1 = vld [vmem:[%s890_s3] sm:$0xff]  ;;  %v36_v2 = vld [vmem:[%s890_s3 + $0x8] sm:$0xff]  ;;  %v37_v3 = vld [vmem:[%s890_s3 + $0x10] sm:$0xff]  ;;  %609 = vmatprep.mubr.msk.f32.mxu0 %vm679_vm0, %v680_v4  ;;  %vm84_vm1 = vcmask 261120   ;;  %vm258_vm2 = vcmask 1043456   ;;  %v76_v15 = vlaneseq  ;;  %vm174_vm3 = vcmask 64512  }
   0x2   :  { %v618_v5 = vpack.c.bf16 %v36_v2, %v35_v1  ;;  %v38_v6 = vld [vmem:[%s890_s3 + $0x18] sm:$0xff]  ;;  %664 = vset.pattern.permute.xlu0 %v681_v7  ;;  %v33_v8 = vld [vmem:[%s891_s1] sm:$0xff]  ;;  %v43_v10 = vld [vmem:[%s892_s7 + $0x8] sm:$0xff]  ;;  %vm254_vm5 = vcmask 31744   ;;  %vm532_vm6 = vcmask 7168  }
   0x3   :  { %79 = vperm.xlu0 %664, %v33_v8   ;;  %v621_v9 = vpack.c.bf16 %v38_v6, %v37_v3  ;;  %v32_v11 = vld [vmem:[%s893_s0] sm:$0xff]  ;;  %v77_v16 = vand.u32 127, %v76_v15  ;;  %v61_v34 = vld [vmem:[%s896_s8 + $0x88] sm:$0xff]  ;;  %v62_v38 = vld [vmem:[%s896_s8 + $0x90] sm:$0xff] }
   0x4   :  { %619 = vmatpush3.bf16.msra.mxu0 %v618_v5  ;;  %v42_v12 = vld [vmem:[%s892_s7] sm:$0xff]  ;;  %v45_v37 = vld [vmem:[%s896_s8 + $0x8] sm:$0xff]  ;;  %v63_v39 = vld [vmem:[%s896_s8 + $0x98] sm:$0xff] }
   0x5   :  { %620 = vmatprep.subr.bf16.mxu0 %v678_v0  ;;  %v41_v13 = vld [vmem:[%s894_s6] sm:$0xff]  ;;  %v627_v41 = vpack.c.bf16 %v63_v39, %v62_v38  ;;  %v46_v42 = vld [vmem:[%s896_s8 + $0x10] sm:$0xff]  ;;  %v47_v43 = vld [vmem:[%s896_s8 + $0x18] sm:$0xff] }
   0x6   :  { %v253_v14 = vcombine.high %v41_v13, %v41_v13  ;;  %v551_v17 = vld [vmem:[%s895_s2] ss:$0 sm:$0xff]  ;;  %v65_v45 = vld [vmem:[%s896_s8 + $0xa8] sm:$0xff]  ;;  %v629_v46 = vpack.c.bf16 %v47_v43, %v46_v42  ;;  %v66_v51 = vld [vmem:[%s896_s8 + $0xb0] sm:$0xff] }
   0x7   :  { %v60_v33 = vld [vmem:[%s896_s8 + $0x80] sm:$0xff]  ;;  %v49_v49 = vld [vmem:[%s896_s8 + $0x28] sm:$0xff]  ;;  %v67_v52 = vld [vmem:[%s896_s8 + $0xb8] sm:$0xff] }
   0x8   :  { %622 = vmatpush3.bf16.msra.mxu0 %v621_v9  ;;  %v44_v35 = vld [vmem:[%s896_s8] sm:$0xff]  ;;  %v623_v36 = vpack.c.bf16 %v61_v34, %v60_v33  ;;  %v635_v53 = vpack.c.bf16 %v67_v52, %v66_v51  ;;  %v50_v54 = vld [vmem:[%s896_s8 + $0x30] sm:$0xff]  ;;  %v51_v55 = vld [vmem:[%s896_s8 + $0x38] sm:$0xff] }
   0x9   :  { %181 = vmatprep.subr.mxu0 %v43_v10  ;;  %v625_v40 = vpack.c.bf16 %v45_v37, %v44_v35  ;;  %v64_v44 = vld [vmem:[%s896_s8 + $0xa0] sm:$0xff]  ;;  %v637_v56 = vpack.c.bf16 %v51_v55, %v50_v54  ;;  %v69_v58 = vld [vmem:[%s896_s8 + $0xc8] sm:$0xff]  ;;  %v70_v63 = vld [vmem:[%s896_s8 + $0xd0] sm:$0xff] }
   0xa   :  { %624 = vmatprep.subr.bf16.mxu1 %v623_v36  ;;  %v631_v47 = vpack.c.bf16 %v65_v45, %v64_v44  ;;  %v48_v48 = vld [vmem:[%s896_s8 + $0x20] sm:$0xff]  ;;  %v53_v61 = vld [vmem:[%s896_s8 + $0x48] sm:$0xff]  ;;  %v71_v0 = vld [vmem:[%s896_s8 + $0xd8] sm:$0xff] }
   0xb   :  { %610 = vmatmul.mubr.msk.f32.vlgmr.msra.gmra.mrb[0].mxu0 %vm84_vm1, %v32_v11  ;;  %626 = vmatpush3.bf16.msra.mxu1 %v625_v40  ;;  %v633_v50 = vpack.c.bf16 %v49_v49, %v48_v48  ;;  %v68_v57 = vld [vmem:[%s896_s8 + $0xc0] sm:$0xff]  ;;  %v643_v1 = vpack.c.bf16 %v71_v0, %v70_v63  ;;  %v54_v2 = vld [vmem:[%s896_s8 + $0x50] sm:$0xff]  ;;  %v55_v3 = vld [vmem:[%s896_s8 + $0x58] sm:$0xff] }
   0xc   :  { %182 = vmatpush1.msra.mxu0 %v42_v12  ;;  %245 = vmatprep.mubr.f32.mxu0 %v680_v4  ;;  %v639_v59 = vpack.c.bf16 %v69_v58, %v68_v57  ;;  %v52_v60 = vld [vmem:[%s896_s8 + $0x40] sm:$0xff]  ;;  %v645_v5 = vpack.c.bf16 %v55_v3, %v54_v2  ;;  %v73_v6 = vld [vmem:[%s896_s8 + $0xe8] sm:$0xff]  ;;  %v74_v11 = vld [vmem:[%s896_s8 + $0xf0] sm:$0xff] }
   0xd   :  { %553 = vmatprep.subr.msk.mxu0 %vm258_vm2, %v253_v14  ;;  %628 = vmatprep.subr.bf16.mxu1 %v627_v41  ;;  %v641_v62 = vpack.c.bf16 %v53_v61, %v52_v60  ;;  %v56_v7 = vld [vmem:[%s896_s8 + $0x60] sm:$0xff]  ;;  %v57_v8 = vld [vmem:[%s896_s8 + $0x68] sm:$0xff]  ;;  %v75_v12 = vld [vmem:[%s896_s8 + $0xf8] sm:$0xff] }
   0xe   :  { %v649_v10 = vpack.c.bf16 %v57_v8, %v56_v7  ;;  %v58_v14 = vld [vmem:[%s896_s8 + $0x70] sm:$0xff]  ;;  %v59_v15 = vld [vmem:[%s896_s8 + $0x78] sm:$0xff]  ;;  %v40_v40 = vld [vmem:[%s897_s5] sm:$0xff]  ;;  %s684_s5 = smov 119  }
   0xf   :  { %630 = vmatpush3.bf16.msra.mxu1 %v629_v46 }
  0x10   :  { %632 = vmatprep.subr.bf16.mxu1 %v631_v47  ;;  %v558_v47 = vld [vmem:[%s898_s4] ss:$0 sm:$0xff] }
  0x13   :  { %634 = vmatpush3.bf16.msra.mxu1 %v633_v50 }
  0x14   :  { %636 = vmatprep.subr.bf16.mxu1 %v635_v53 }
  0x17   :  { %638 = vmatpush3.bf16.msra.mxu1 %v637_v56 }
  0x18   :  { %640 = vmatprep.subr.bf16.mxu1 %v639_v59 }
  0x1b   :  { %642 = vmatpush3.bf16.msra.mxu1 %v641_v62 }
  0x1c   :  { %644 = vmatprep.subr.bf16.mxu1 %v643_v1 }
  0x1f   :  { %646 = vmatpush3.bf16.msra.mxu1 %v645_v5 }
  0x82   :  { %v80_v18 = vpop.permute.xlu0 %79 }
  0x83   :  { %vm81_vm4 = vcmp.eq.s32.totalorder %v77_v16, %v80_v18  ;;  %v653_v16 = vpack.c.bf16 %v59_v15, %v58_v14 }
  0x84   :  { %v772_v23 = vsel %vm81_vm4, 1.0, %v680_v4 }
  0xde   :  { %v154_v19 = vpop.f32.mrb[0].mxu0 }
  0xdf   :  { %v767_v20 = vadd.f32 %v551_v17, %v154_v19  ;;  %v611_v21 = vpop.f32.mrb[1].mxu0 }
  0xe1   :  { %v166_v22 = vand.u32 2147483647, %v767_v20  ;;  %552 = vmatmul.mubr.msk.f32.vlgmr.msra.gmra.mrb[2].mxu0 %vm174_vm3, %v767_v20  ;;  %v165_v29 = vmax.f32 %v767_v20, 0.0 }
  0xe2   :  { %554 = vmatpush1.msk.msra.mxu0 %vm258_vm2, %v41_v13  ;;  %327 = vmatprep.mubr.f32.mxu0 %v680_v4  ;;  %v651_v13 = vpack.c.bf16 %v75_v12, %v74_v11 }
  0xe3   :  { %v167_v24 = vsub.f32 0.0, %v166_v22  ;;  %612 = vmatprep.subr.mxu0 %v680_v4 }
  0xe5   :  { %v168_v25 = vmul.f32 1.442695, %v167_v24  ;;  %555 = vmatmul.mubr.msk.f32.vlgmr.msra.gmra.mrb[4].mxu0 %vm254_vm5, %v772_v23 }
  0xe6   :  { %614 = vmatprep.mubr.msk.f32.mxu0 %vm679_vm0, %v680_v4  ;;  %v72_v4 = vld [vmem:[%s896_s8 + $0xe0] sm:$0xff]  ;;  %613 = vmatpush3.msra.mxu0 %v40_v40 }
  0xe7   :  { %668 = vpow2.f32 %v168_v25  ;;  %v647_v9 = vpack.c.bf16 %v73_v6, %v72_v4 }
  0xe9   :  { %648 = vmatprep.subr.bf16.mxu1 %v647_v9 }
  0xea   :  { %650 = vmatpush3.bf16.msra.mxu1 %v649_v10 }
  0xeb   :  { %652 = vmatprep.subr.bf16.mxu1 %v651_v13 }
  0xee   :  { %654 = vmatpush3.bf16.msra.mxu1 %v653_v16 }
  0xf1   :  { %v669_v26 = vpop.eup %668 }
  0xf2   :  { %v170_v27 = vadd.f32 1.0, %v669_v26 }
  0xf4   :  { %670 = vlog2.f32 %v170_v27 }
  0xfe   :  { %v671_v28 = vpop.eup %670 }
  0xff   :  { %v172_v30 = vmul.f32 0.6931472, %v671_v28 }
 0x101   :  { %v173_v31 = vadd.f32 %v172_v30, %v165_v29 }
 0x103   :  { %v175_v32 = vsel %vm174_vm3, %v173_v31, 0.0 }
 0x104   :  { %176 = vadd.xlane.f32.xlu0 %v175_v32  ;;  %v682_v32 = vmov 8  }
 0x105   :  { %665 = vset.pattern.permute.xlu1 %v682_v32  ;;  %666 = vset.pattern.permute.xlu0 %v682_v32 }
 0x191   :  { %v177_v17 = vpop.xlane.xlu0 %176 }
 0x1b4   :  { %v247_v18 = vpop.f32.mrb[2].mxu0 }
 0x1b5   :  { %v334_v19 = vsub.f32 %v247_v18, %v177_v17  ;;  %v249_v21 = vpop.f32.mrb[3].mxu0 }
 0x1b6   :  { %v335_v22 = vsub.f32 %v249_v21, %v177_v17 }
 0x1b7   :  { %v336_v24 = vmul.f32 1.442695, %v334_v19 }
 0x1b8   :  { %v338_v25 = vmul.f32 1.442695, %v335_v22  ;;  %v329_v26 = vpop.f32.mrb[4].mxu0 }
 0x1b9   :  { %672 = vpow2.f32 %v336_v24  ;;  %v331_v27 = vpop.f32.mrb[5].mxu0 }
 0x1ba   :  { %674 = vpow2.f32 %v338_v25 }
 0x1c3   :  { %v673_v28 = vpop.eup %672 }
 0x1c4   :  { %v675_v29 = vpop.eup %674  ;;  %v340_v30 = vmul.f32 %v673_v28, %v329_v26 }
 0x1c5   :  { %v341_v31 = vmul.f32 %v675_v29, %v331_v27 }
 0x1c7   :  { %406 = vmatprep.mubr.f32.mxu1 %v341_v31 }
 0x1c8   :  { %407 = vmatmul.mubr.f32.vlgmr.msra.gmra.mrb[0].mxu1 %v340_v30 }
 0x29b   :  { %v596_v33 = vpop.f32.mrb[0].mxu1 }
 0x29c   :  { %v597_v34 = vpop.f32.mrb[1].mxu1 }
 0x29d   :  { %v598_v35 = vadd.f32 %v597_v34, %v596_v33 }
 0x29f   :  { %676 = vrcp.f32 %v598_v35 }
 0x2a9   :  { %v677_v36 = vpop.eup %676 }
 0x2aa   :  { %v413_v37 = vmul.f32 %v677_v36, %v598_v35 }
 0x2ac   :  { %v414_v38 = vsub.f32 2.0, %v413_v37 }
 0x2ae   :  { %v415_v39 = vmul.f32 %v677_v36, %v414_v38 }
 0x2b0   :  { %418 = vperm.xlu1 %665, %v415_v39  }
 0x32f   :  { %v419_v41 = vpop.permute.xlu1 %418 }
 0x330   :  { %v421_v42 = vmul.f32 %v598_v35, %v419_v41 }
 0x332   :  { %v422_v43 = vmul.f32 2.0, %v421_v42  ;;  %v512_v44 = vmul.f32 %v421_v42, %v767_v20 }
 0x334   :  { %v556_v45 = vadd.f32 -1.0, %v422_v43  ;;  %v513_v46 = vsel %vm174_vm3, %v512_v44, 0.0 }
 0x335   :  { %514 = vadd.xlane.f32.xlu0 %v513_v46 }
 0x336   :  { %615 = vmatmul.mubr.msk.f32.vlgmr.msra.gmra.mrb[6].mxu0 %vm174_vm3, %v556_v45 }
 0x34b   :  { %508 = vrot.lane.b32.xlu0 %v415_v39, %s683_s13 }
 0x3c2   :  { %v515_v20 = vpop.xlane.xlu0 %514 }
 0x3c6   :  { %v509_v53 = vpop.permute.xlu0 %508 }
 0x3c7   :  { %v511_v54 = vmul.f32 %v598_v35, %v509_v53 }
 0x409   :  { %v493_v48 = vpop.f32.mrb[6].mxu0 }
 0x40a   :  { %v503_v49 = vadd.f32 %v558_v47, %v493_v48  ;;  %v616_v50 = vpop.f32.mrb[7].mxu0 }
 0x40c   :  { %v504_v51 = vmul.f32 %v772_v23, %v503_v49 }
 0x40e   :  { %v505_v52 = vsel %vm254_vm5, %v504_v51, 0.0 }
 0x40f   :  { %506 = vadd.xlane.f32.xlu1 %v505_v52 }
 0x49c   :  { %v507_v55 = vpop.xlane.xlu1 %506 }
 0x49d   :  { %v516_v56 = vsub.f32 %v507_v55, %v511_v54 }
 0x49f   :  { %v517_v57 = vadd.f32 %v516_v56, %v515_v20 }
 0x4a1   :  { %v518_v58 = vsub.f32 %v517_v57, %v177_v17 }
 0x4a3   :  { %529 = vrot.lane.b32.xlu1 %v518_v58, %s684_s5 }
 0x515   :  { %v530_v59 = vpop.permute.xlu1 %529 }
 0x516   :  { %v533_v60 = vsel %vm532_vm6, %v530_v59, 0.0 }
 0x517   :  { %534 = vadd.xlane.f32.xlu1 %v533_v60 }
 0x5a4   :  { %v535_v61 = vpop.xlane.xlu1 %534 }
 0x5a5   :  { %v536_v62 = vrot.slane %v535_v61, 4 }
 0x5a7   :  { %v537_v63 = vadd.f32 %v536_v62, %v535_v61 }
 0x5a9   :  { %v538_v23 = vrot.slane %v537_v63, 2 }
 0x5ab   :  { %v539_v0 = vadd.f32 %v538_v23, %v537_v63 }
 0x5ad   :  { %v540_v1 = vrot.slane %v539_v0, 1 }
 0x5af   :  { %v541_v2 = vadd.f32 %v540_v1, %v539_v0 }
 0x5b1   :  { %655 = vpush %v541_v2 }
 0x5e2   :  { %s656_s4 = spop %655 }
 0x5e3   :  { %v543_v3 = vstv %s656_s4 }
 0x5e4   :  { %544 = vst [vmem:[%s899_s9] sm:$0xff] %v543_v3 }

</bundles_post_ra>
